<compile_context>
chip_gen: v5e
topology: v5e:2x2
jax: 0.10.0
libtpu: 0.0.40
codegen_flags: <defaults>
</compile_context>

<pallas_src>
import jax
import jax.numpy as jnp
from jax.experimental import pallas as pl
from jax.experimental.pallas import tpu as pltpu


def _chp_kernel(x_ref, qw1_ref, qw2_ref, kw1_ref, kw2_ref, qdd_ref, kdd_ref, o_ref):
    # x_ref:   (N, Tb, Sb)
    # qw1_ref, qw2_ref: (I, N, Tb)    (query-position-indexed low-rank mixing)
    # kw1_ref, kw2_ref: (I, N, Sb)    (key-position-indexed low-rank mixing)
    # qdd_ref: (N, Tb)   kdd_ref: (N, Sb)   (per-head diagonal terms)
    x = x_ref[...].astype(jnp.float32)                      # (N, Tb, Sb)

    # Identity + diagonal terms fused into a single scale multiply:
    #   x + x*qdd + x*kdd  ==  x * (1 + qdd + kdd)
    qdd = qdd_ref[...].astype(jnp.float32)                  # (N, Tb)
    kdd = kdd_ref[...].astype(jnp.float32)                  # (N, Sb)
    scale = (1.0 + qdd)[:, :, None] + kdd[:, None, :]       # (N, Tb, Sb)
    acc = x * scale

    # Low-rank cross-head terms; I is static and small, unroll.
    num_ranks = qw1_ref.shape[0]
    for i in range(num_ranks):
        qw1_i = qw1_ref[i].astype(jnp.float32)              # (N, Tb)
        qw2_i = qw2_ref[i].astype(jnp.float32)              # (N, Tb)
        kw1_i = kw1_ref[i].astype(jnp.float32)              # (N, Sb)
        kw2_i = kw2_ref[i].astype(jnp.float32)              # (N, Sb)

        # Cross-head contractions (reduce over leading head axis N — pure VPU).
        hq = jnp.sum(x * qw1_i[:, :, None], axis=0)         # (Tb, Sb)
        hk = jnp.sum(x * kw1_i[:, None, :], axis=0)         # (Tb, Sb)

        # Single fused accumulate per rank (query + key side together).
        acc = acc + (hq[None, :, :] * qw2_i[:, :, None]
                     + hk[None, :, :] * kw2_i[:, None, :])  # (N, Tb, Sb)

    o_ref[...] = acc.astype(o_ref.dtype)


def cross_head_projection(inputs, qw1, qw2, kw1, kw2, qdd, kdd,
                          *, t_block=128, s_block=256):
    """Default (dws, fast_infer, use_sw=False) forward of CrossHeadProjection.

    inputs: (B, N, T, S); qw1/qw2: (B, T, 1, I, N); kw1/kw2: (B, S, 1, I, N);
    qdd: (B, T, 1, N); kdd: (B, S, 1, N).  Returns (B, N, T, S).
    """
    B, N, T, S = inputs.shape
    assert qw1.shape[2] == 1, "forward pass (unsqueeze(1)) implies num_groups == 1"
    I = qw1.shape[3]
    assert qw1.shape == (B, T, 1, I, N) and qw2.shape == (B, T, 1, I, N)
    assert kw1.shape == (B, S, 1, I, N) and kw2.shape == (B, S, 1, I, N)
    assert qdd.shape == (B, T, 1, N) and kdd.shape == (B, S, 1, N)

    # Kernel-friendly weight layouts (tiny tensors; pure layout plumbing):
    #   head dim N leading (reduction / broadcast axis), seq position in lanes.
    qw1t = jnp.transpose(qw1[:, :, 0], (0, 2, 3, 1))        # (B, I, N, T)
    qw2t = jnp.transpose(qw2[:, :, 0], (0, 2, 3, 1))        # (B, I, N, T)
    kw1t = jnp.transpose(kw1[:, :, 0], (0, 2, 3, 1))        # (B, I, N, S)
    kw2t = jnp.transpose(kw2[:, :, 0], (0, 2, 3, 1))        # (B, I, N, S)
    qddt = jnp.transpose(qdd[:, :, 0], (0, 2, 1))           # (B, N, T)
    kddt = jnp.transpose(kdd[:, :, 0], (0, 2, 1))           # (B, N, S)

    # Block sizes: full dim when small; otherwise multiples of 128 (the tiled
    # seq dims are lane dims of the weight blocks and sublane/lane dims of x).
    if T <= t_block:
        Tb = T
    else:
        assert t_block % 128 == 0, "t_block must be a multiple of 128 when tiling T"
        Tb = t_block
    if S <= s_block:
        Sb = S
    else:
        assert s_block % 128 == 0, "s_block must be a multiple of 128 when tiling S"
        Sb = s_block

    grid = (B, pl.cdiv(T, Tb), pl.cdiv(S, Sb))

    # Advisory cost estimate (mem-bound op: ~ (8*I + 3) VPU flops / element).
    n_elem = B * N * T * S
    flops = n_elem * (8 * I + 3)
    bytes_accessed = (inputs.size + n_elem) * inputs.dtype.itemsize \
        + sum(a.size * a.dtype.itemsize for a in (qw1t, qw2t, kw1t, kw2t, qddt, kddt))
    cost = pl.CostEstimate(flops=flops, transcendentals=0,
                           bytes_accessed=bytes_accessed)

    return pl.pallas_call(
        _chp_kernel,
        out_shape=jax.ShapeDtypeStruct((B, N, T, S), inputs.dtype),
        grid_spec=pltpu.PrefetchScalarGridSpec(
            num_scalar_prefetch=0,
            grid=grid,
            in_specs=[
                pl.BlockSpec((None, N, Tb, Sb), lambda b, it, js: (b, 0, it, js)),
                pl.BlockSpec((None, I, N, Tb), lambda b, it, js: (b, 0, 0, it)),
                pl.BlockSpec((None, I, N, Tb), lambda b, it, js: (b, 0, 0, it)),
                pl.BlockSpec((None, I, N, Sb), lambda b, it, js: (b, 0, 0, js)),
                pl.BlockSpec((None, I, N, Sb), lambda b, it, js: (b, 0, 0, js)),
                pl.BlockSpec((None, N, Tb), lambda b, it, js: (b, 0, it)),
                pl.BlockSpec((None, N, Sb), lambda b, it, js: (b, 0, js)),
            ],
            out_specs=pl.BlockSpec((None, N, Tb, Sb), lambda b, it, js: (b, 0, it, js)),
        ),
        compiler_params=pltpu.CompilerParams(
            dimension_semantics=("parallel", "parallel", "parallel"),
            vmem_limit_bytes=64 * 1024 * 1024,
        ),
        cost_estimate=cost,
    )(inputs, qw1t, qw2t, kw1t, kw2t, qddt, kddt)


def _reference(inputs, qw1, qw2, kw1, kw2, qdd, kdd):
    """Plain-JAX mirror of the PyTorch fast_infer / use_sw=False path."""
    x5 = inputs[:, None]                                     # (B, G=1, N, T, S)
    ret = x5
    I = qw1.shape[3]
    for i in range(I):
        hidden = jnp.einsum('BGMTS,BTGM->BGTS', x5, qw1[..., i, :])
        ret = ret + jnp.einsum('BGTS,BTGM->BGMTS', hidden, qw2[..., i, :])
    for i in range(I):
        hidden = jnp.einsum('BGMTS,BSGM->BGTS', x5, kw1[..., i, :])
        ret = ret + jnp.einsum('BGTS,BSGM->BGMTS', hidden, kw2[..., i, :])
    ret = ret + jnp.einsum('BGMTS,BTGM->BGMTS', x5, qdd)
    ret = ret + jnp.einsum('BGMTS,BSGM->BGMTS', x5, kdd)
    return ret[:, 0]


def _make_inputs(key, B, N, T, S, I, dtype):
    ks = jax.random.split(key, 7)
    G = 1
    inputs = jax.random.normal(ks[0], (B, N, T, S), dtype=dtype)
    qw1 = (0.1 * jax.random.normal(ks[1], (B, T, G, I, N))).astype(dtype)
    qw2 = (0.1 * jax.random.normal(ks[2], (B, T, G, I, N))).astype(dtype)
    kw1 = (0.1 * jax.random.normal(ks[3], (B, S, G, I, N))).astype(dtype)
    kw2 = (0.1 * jax.random.normal(ks[4], (B, S, G, I, N))).astype(dtype)
    qdd = (0.1 * jax.random.normal(ks[5], (B, T, G, N))).astype(dtype)
    kdd = (0.1 * jax.random.normal(ks[6], (B, S, G, N))).astype(dtype)
    return inputs, qw1, qw2, kw1, kw2, qdd, kdd


if __name__ == "__main__":
    key = jax.random.PRNGKey(0)
    k1, k2 = jax.random.split(key)
    dtype = jnp.float32   # module default is fp16; kernel computes in f32 either way

    # Small shape matching the module defaults (num_heads=16, groups=1, I=2).
    args_small = _make_inputs(k1, B=2, N=16, T=8, S=8, I=2, dtype=dtype)
    out = jax.block_until_ready(cross_head_projection(*args_small))
    ref = _reference(*args_small)
    assert out.shape == args_small[0].shape
    assert jnp.allclose(out, ref, atol=1e-4, rtol=1e-4), "small-shape mismatch vs reference"

    # Tiled shape (exercises the T/S grid and lane-dense tiled stores).
    args_tiled = _make_inputs(k2, B=1, N=16, T=256, S=384, I=2, dtype=dtype)
    out = jax.block_until_ready(cross_head_projection(*args_tiled))
    ref = _reference(*args_tiled)
    assert out.shape == args_tiled[0].shape
    assert jnp.allclose(out, ref, atol=1e-4, rtol=1e-4), "tiled-shape mismatch vs reference"

    print("KERNEL_OK")
</pallas_src>

<mosaic_0001>
module attributes {stable_mosaic.version = 11 : i64} {
  func.func @_chp_kernel(%arg0: i32, %arg1: i32, %arg2: i32, %arg3: memref<1x16x8x8xf32, #tpu.memory_space<vmem>>, %arg4: memref<1x2x16x8xf32, #tpu.memory_space<vmem>>, %arg5: memref<1x2x16x8xf32, #tpu.memory_space<vmem>>, %arg6: memref<1x2x16x8xf32, #tpu.memory_space<vmem>>, %arg7: memref<1x2x16x8xf32, #tpu.memory_space<vmem>>, %arg8: memref<1x16x8xf32, #tpu.memory_space<vmem>>, %arg9: memref<1x16x8xf32, #tpu.memory_space<vmem>>, %arg10: memref<1x16x8x8xf32, #tpu.memory_space<vmem>>) attributes {dimension_semantics = [#tpu.dimension_semantics<parallel>, #tpu.dimension_semantics<parallel>, #tpu.dimension_semantics<parallel>], iteration_bounds = array<i64: 2, 1, 1>, scalar_prefetch = 0 : i64, scratch_operands = 0 : i64, tpu.core_type = #tpu.core_type<tc>, window_params = [{transform_indices = @transform_0, window_bounds = array<i64: 1, 16, 8, 8>}, {transform_indices = @transform_1, window_bounds = array<i64: 1, 2, 16, 8>}, {transform_indices = @transform_2, window_bounds = array<i64: 1, 2, 16, 8>}, {transform_indices = @transform_3, window_bounds = array<i64: 1, 2, 16, 8>}, {transform_indices = @transform_4, window_bounds = array<i64: 1, 2, 16, 8>}, {transform_indices = @transform_5, window_bounds = array<i64: 1, 16, 8>}, {transform_indices = @transform_6, window_bounds = array<i64: 1, 16, 8>}, {transform_indices = @transform_7, window_bounds = array<i64: 1, 16, 8, 8>}]} {
    %c0 = arith.constant 0 : index
    %c0_0 = arith.constant 0 : index
    %c0_1 = arith.constant 0 : index
    %c0_2 = arith.constant 0 : index
    %0 = vector.load %arg3[%c0, %c0_0, %c0_1, %c0_2] : memref<1x16x8x8xf32, #tpu.memory_space<vmem>>, vector<1x16x8x8xf32>
    %1 = vector.shape_cast %0 : vector<1x16x8x8xf32> to vector<16x8x8xf32>
    %c0_3 = arith.constant 0 : index
    %c0_4 = arith.constant 0 : index
    %c0_5 = arith.constant 0 : index
    %2 = vector.load %arg8[%c0_3, %c0_4, %c0_5] : memref<1x16x8xf32, #tpu.memory_space<vmem>>, vector<1x16x8xf32>
    %3 = vector.shape_cast %2 : vector<1x16x8xf32> to vector<16x8xf32>
    %c0_6 = arith.constant 0 : index
    %c0_7 = arith.constant 0 : index
    %c0_8 = arith.constant 0 : index
    %4 = vector.load %arg9[%c0_6, %c0_7, %c0_8] : memref<1x16x8xf32, #tpu.memory_space<vmem>>, vector<1x16x8xf32>
    %5 = vector.shape_cast %4 : vector<1x16x8xf32> to vector<16x8xf32>
    %cst = arith.constant 1.000000e+00 : f32
    %6 = vector.broadcast %cst : f32 to vector<16x8xf32>
    %7 = arith.addf %6, %3 : vector<16x8xf32>
    %8 = vector.shape_cast %7 : vector<16x8xf32> to vector<16x8x1xf32>
    %9 = vector.shape_cast %5 : vector<16x8xf32> to vector<16x1x8xf32>
    %10 = vector.broadcast %8 : vector<16x8x1xf32> to vector<16x8x8xf32>
    %11 = vector.broadcast %9 : vector<16x1x8xf32> to vector<16x8x8xf32>
    %12 = arith.addf %10, %11 : vector<16x8x8xf32>
    %13 = arith.mulf %1, %12 : vector<16x8x8xf32>
    %c0_9 = arith.constant 0 : index
    %c0_10 = arith.constant 0 : index
    %c0_11 = arith.constant 0 : index
    %c0_12 = arith.constant 0 : index
    %14 = vector.load %arg4[%c0_9, %c0_10, %c0_11, %c0_12] : memref<1x2x16x8xf32, #tpu.memory_space<vmem>>, vector<1x1x16x8xf32>
    %15 = vector.shape_cast %14 : vector<1x1x16x8xf32> to vector<16x8xf32>
    %c0_13 = arith.constant 0 : index
    %c0_14 = arith.constant 0 : index
    %c0_15 = arith.constant 0 : index
    %c0_16 = arith.constant 0 : index
    %16 = vector.load %arg5[%c0_13, %c0_14, %c0_15, %c0_16] : memref<1x2x16x8xf32, #tpu.memory_space<vmem>>, vector<1x1x16x8xf32>
    %17 = vector.shape_cast %16 : vector<1x1x16x8xf32> to vector<16x8xf32>
    %c0_17 = arith.constant 0 : index
    %c0_18 = arith.constant 0 : index
    %c0_19 = arith.constant 0 : index
    %c0_20 = arith.constant 0 : index
    %18 = vector.load %arg6[%c0_17, %c0_18, %c0_19, %c0_20] : memref<1x2x16x8xf32, #tpu.memory_space<vmem>>, vector<1x1x16x8xf32>
    %19 = vector.shape_cast %18 : vector<1x1x16x8xf32> to vector<16x8xf32>
    %c0_21 = arith.constant 0 : index
    %c0_22 = arith.constant 0 : index
    %c0_23 = arith.constant 0 : index
    %c0_24 = arith.constant 0 : index
    %20 = vector.load %arg7[%c0_21, %c0_22, %c0_23, %c0_24] : memref<1x2x16x8xf32, #tpu.memory_space<vmem>>, vector<1x1x16x8xf32>
    %21 = vector.shape_cast %20 : vector<1x1x16x8xf32> to vector<16x8xf32>
    %22 = vector.shape_cast %15 : vector<16x8xf32> to vector<16x8x1xf32>
    %23 = vector.broadcast %22 : vector<16x8x1xf32> to vector<16x8x8xf32>
    %24 = arith.mulf %1, %23 : vector<16x8x8xf32>
    %cst_25 = arith.constant dense<0.000000e+00> : vector<8x8xf32>
    %25 = vector.multi_reduction <add>, %24, %cst_25 [0] : vector<16x8x8xf32> to vector<8x8xf32>
    %26 = vector.shape_cast %19 : vector<16x8xf32> to vector<16x1x8xf32>
    %27 = vector.broadcast %26 : vector<16x1x8xf32> to vector<16x8x8xf32>
    %28 = arith.mulf %1, %27 : vector<16x8x8xf32>
    %cst_26 = arith.constant dense<0.000000e+00> : vector<8x8xf32>
    %29 = vector.multi_reduction <add>, %28, %cst_26 [0] : vector<16x8x8xf32> to vector<8x8xf32>
    %30 = vector.shape_cast %25 : vector<8x8xf32> to vector<1x8x8xf32>
    %31 = vector.shape_cast %17 : vector<16x8xf32> to vector<16x8x1xf32>
    %32 = vector.broadcast %30 : vector<1x8x8xf32> to vector<16x8x8xf32>
    %33 = vector.broadcast %31 : vector<16x8x1xf32> to vector<16x8x8xf32>
    %34 = arith.mulf %32, %33 : vector<16x8x8xf32>
    %35 = vector.shape_cast %29 : vector<8x8xf32> to vector<1x8x8xf32>
    %36 = vector.shape_cast %21 : vector<16x8xf32> to vector<16x1x8xf32>
    %37 = vector.broadcast %35 : vector<1x8x8xf32> to vector<16x8x8xf32>
    %38 = vector.broadcast %36 : vector<16x1x8xf32> to vector<16x8x8xf32>
    %39 = arith.mulf %37, %38 : vector<16x8x8xf32>
    %40 = arith.addf %34, %39 : vector<16x8x8xf32>
    %41 = arith.addf %13, %40 : vector<16x8x8xf32>
    %c0_27 = arith.constant 0 : index
    %c1 = arith.constant 1 : index
    %c0_28 = arith.constant 0 : index
    %c0_29 = arith.constant 0 : index
    %42 = vector.load %arg4[%c0_27, %c1, %c0_28, %c0_29] : memref<1x2x16x8xf32, #tpu.memory_space<vmem>>, vector<1x1x16x8xf32>
    %43 = vector.shape_cast %42 : vector<1x1x16x8xf32> to vector<16x8xf32>
    %c0_30 = arith.constant 0 : index
    %c1_31 = arith.constant 1 : index
    %c0_32 = arith.constant 0 : index
    %c0_33 = arith.constant 0 : index
    %44 = vector.load %arg5[%c0_30, %c1_31, %c0_32, %c0_33] : memref<1x2x16x8xf32, #tpu.memory_space<vmem>>, vector<1x1x16x8xf32>
    %45 = vector.shape_cast %44 : vector<1x1x16x8xf32> to vector<16x8xf32>
    %c0_34 = arith.constant 0 : index
    %c1_35 = arith.constant 1 : index
    %c0_36 = arith.constant 0 : index
    %c0_37 = arith.constant 0 : index
    %46 = vector.load %arg6[%c0_34, %c1_35, %c0_36, %c0_37] : memref<1x2x16x8xf32, #tpu.memory_space<vmem>>, vector<1x1x16x8xf32>
    %47 = vector.shape_cast %46 : vector<1x1x16x8xf32> to vector<16x8xf32>
    %c0_38 = arith.constant 0 : index
    %c1_39 = arith.constant 1 : index
    %c0_40 = arith.constant 0 : index
    %c0_41 = arith.constant 0 : index
    %48 = vector.load %arg7[%c0_38, %c1_39, %c0_40, %c0_41] : memref<1x2x16x8xf32, #tpu.memory_space<vmem>>, vector<1x1x16x8xf32>
    %49 = vector.shape_cast %48 : vector<1x1x16x8xf32> to vector<16x8xf32>
    %50 = vector.shape_cast %43 : vector<16x8xf32> to vector<16x8x1xf32>
    %51 = vector.broadcast %50 : vector<16x8x1xf32> to vector<16x8x8xf32>
    %52 = arith.mulf %1, %51 : vector<16x8x8xf32>
    %cst_42 = arith.constant dense<0.000000e+00> : vector<8x8xf32>
    %53 = vector.multi_reduction <add>, %52, %cst_42 [0] : vector<16x8x8xf32> to vector<8x8xf32>
    %54 = vector.shape_cast %47 : vector<16x8xf32> to vector<16x1x8xf32>
    %55 = vector.broadcast %54 : vector<16x1x8xf32> to vector<16x8x8xf32>
    %56 = arith.mulf %1, %55 : vector<16x8x8xf32>
    %cst_43 = arith.constant dense<0.000000e+00> : vector<8x8xf32>
    %57 = vector.multi_reduction <add>, %56, %cst_43 [0] : vector<16x8x8xf32> to vector<8x8xf32>
    %58 = vector.shape_cast %53 : vector<8x8xf32> to vector<1x8x8xf32>
    %59 = vector.shape_cast %45 : vector<16x8xf32> to vector<16x8x1xf32>
    %60 = vector.broadcast %58 : vector<1x8x8xf32> to vector<16x8x8xf32>
    %61 = vector.broadcast %59 : vector<16x8x1xf32> to vector<16x8x8xf32>
    %62 = arith.mulf %60, %61 : vector<16x8x8xf32>
    %63 = vector.shape_cast %57 : vector<8x8xf32> to vector<1x8x8xf32>
    %64 = vector.shape_cast %49 : vector<16x8xf32> to vector<16x1x8xf32>
    %65 = vector.broadcast %63 : vector<1x8x8xf32> to vector<16x8x8xf32>
    %66 = vector.broadcast %64 : vector<16x1x8xf32> to vector<16x8x8xf32>
    %67 = arith.mulf %65, %66 : vector<16x8x8xf32>
    %68 = arith.addf %62, %67 : vector<16x8x8xf32>
    %69 = arith.addf %41, %68 : vector<16x8x8xf32>
    %c0_44 = arith.constant 0 : index
    %c0_45 = arith.constant 0 : index
    %c0_46 = arith.constant 0 : index
    %c0_47 = arith.constant 0 : index
    %70 = vector.load %arg10[%c0_44, %c0_45, %c0_46, %c0_47] : memref<1x16x8x8xf32, #tpu.memory_space<vmem>>, vector<1x16x8x8xf32>
    %71 = vector.shape_cast %70 : vector<1x16x8x8xf32> to vector<16x8x8xf32>
    %72 = vector.shape_cast %69 : vector<16x8x8xf32> to vector<1x16x8x8xf32>
    tpu.vector_store %arg10[%c0_44, %c0_45, %c0_46, %c0_47], %72 {strides = array<i32>} : memref<1x16x8x8xf32, #tpu.memory_space<vmem>>, vector<1x16x8x8xf32>,
    return
  }
  func.func @transform_0(%arg0: i32, %arg1: i32, %arg2: i32) -> (i32, i32, i32, i32) {
    %c0_i32 = arith.constant 0 : i32
    %c0_i32_0 = arith.constant 0 : i32
    return %arg0, %c0_i32, %arg1, %arg2 : i32, i32, i32, i32
  }
  func.func @transform_1(%arg0: i32, %arg1: i32, %arg2: i32) -> (i32, i32, i32, i32) {
    %c0_i32 = arith.constant 0 : i32
    %c0_i32_0 = arith.constant 0 : i32
    %c0_i32_1 = arith.constant 0 : i32
    return %arg0, %c0_i32, %c0_i32_0, %arg1 : i32, i32, i32, i32
  }
  func.func @transform_2(%arg0: i32, %arg1: i32, %arg2: i32) -> (i32, i32, i32, i32) {
    %c0_i32 = arith.constant 0 : i32
    %c0_i32_0 = arith.constant 0 : i32
    %c0_i32_1 = arith.constant 0 : i32
    return %arg0, %c0_i32, %c0_i32_0, %arg1 : i32, i32, i32, i32
  }
  func.func @transform_3(%arg0: i32, %arg1: i32, %arg2: i32) -> (i32, i32, i32, i32) {
    %c0_i32 = arith.constant 0 : i32
    %c0_i32_0 = arith.constant 0 : i32
    %c0_i32_1 = arith.constant 0 : i32
    return %arg0, %c0_i32, %c0_i32_0, %arg2 : i32, i32, i32, i32
  }
  func.func @transform_4(%arg0: i32, %arg1: i32, %arg2: i32) -> (i32, i32, i32, i32) {
    %c0_i32 = arith.constant 0 : i32
    %c0_i32_0 = arith.constant 0 : i32
    %c0_i32_1 = arith.constant 0 : i32
    return %arg0, %c0_i32, %c0_i32_0, %arg2 : i32, i32, i32, i32
  }
  func.func @transform_5(%arg0: i32, %arg1: i32, %arg2: i32) -> (i32, i32, i32) {
    %c0_i32 = arith.constant 0 : i32
    %c0_i32_0 = arith.constant 0 : i32
    return %arg0, %c0_i32, %arg1 : i32, i32, i32
  }
  func.func @transform_6(%arg0: i32, %arg1: i32, %arg2: i32) -> (i32, i32, i32) {
    %c0_i32 = arith.constant 0 : i32
    %c0_i32_0 = arith.constant 0 : i32
    return %arg0, %c0_i32, %arg2 : i32, i32, i32
  }
  func.func @transform_7(%arg0: i32, %arg1: i32, %arg2: i32) -> (i32, i32, i32, i32) {
    %c0_i32 = arith.constant 0 : i32
    %c0_i32_0 = arith.constant 0 : i32
    return %arg0, %c0_i32, %arg1, %arg2 : i32, i32, i32, i32
  }
}

</mosaic_0001>

<bundles_post_ra>
// kernel: tpu_custom_call.1
= control target key start
LH: loop header
LB: loop body
LE: loop exit
PB: predicated region body
PF: predicated region fallthrough
CT: control target
= control target key end

     0   :  { %s2069_s24 = smov 0   ;;  %s2071_s25 = smov 0   ;;  %s2738_s0 = inlined_call_operand.vmem [shape: f32[2,16,8,8], index: 0, kind: input, shape index: {}]   ;;  %s2739_s1 = inlined_call_operand.vmem [shape: f32[2,2,16,8], index: 1, kind: input, shape index: {}]   ;;  %s2740_s2 = inlined_call_operand.vmem [shape: f32[2,2,16,8], index: 2, kind: input, shape index: {}]   ;;  %s2741_s3 = inlined_call_operand.vmem [shape: f32[2,2,16,8], index: 3, kind: input, shape index: {}]   ;;  %s2742_s4 = inlined_call_operand.vmem [shape: f32[2,2,16,8], index: 4, kind: input, shape index: {}]   ;;  %s2743_s5 = inlined_call_operand.vmem [shape: f32[2,16,8], index: 5, kind: input, shape index: {}]   ;;  %s2744_s6 = inlined_call_operand.vmem [shape: f32[2,16,8], index: 6, kind: input, shape index: {}]   ;;  %s2745_s7 = inlined_call_operand.vmem [shape: f32[2,16,8,8], index: 7, kind: output, shape index: {}]  }
   0x1   :  { %s2073_s26 = smov 0  }
   0x2 LB: > { %s36_s27 = sadd.s32 1, %s2023_s25  ;;  %p1940_p0 = scmp.ge.s32.totalorder %s2027_s26, 1  ;;  %s2027_s26 = sphi %s2073_s26, %s17_s26   ;;  %s2023_s25 = sphi %s2071_s25, %s2765_s25   ;;  %s2019_s24 = sphi %s2069_s24, %s2764_s24  }
   0x3   : > { %p38_p1 = scmp.ge.s32.totalorder %s36_s27, 2  ;;  %p360_p2 = scmp.lt.s32.totalorder %s2027_s26, 3 }
   0x5   : > { %s2767_s27 = smov (%p38_p1, %s36_s27), 0  ;;  %p361_p3 = pnand %p1940_p0, %p360_p2 }
   0x7   : > { %364 = sbr.rel (%p361_p3) target bundleno = 355 (0x163), region = 48 }
   0xc   : > { %v545_v0 = vlaneseq  ;;  %p452_p4 = scmp.lt.s32.totalorder %s2019_s24, 1  ;;  %vm872_vm0 = vcmask 64512  }
   0xe   : > { %v546_v1 = vshrl.u32 %v545_v0, 7  ;;  %s2769_s24 = smov (!%p452_p4, %s2019_s24), 1 }
   0xf   : > { %s1972_s28 = sshll.u32 %s2769_s24, 4  ;;  %s2096_s9 = sshll.u32 %s2769_s24, 5 }
  0x10   : > { %2001 = vset.pattern.permute.xlu2 %v546_v1  ;;  %2000 = vset.pattern.permute.xlu1 %v546_v1  ;;  %s502_s8 = scalar_lea.vmem %s2743_s5, %s1972_s28  ;;  %s2102_s12 = scalar_lea.vmem %s2739_s1, %s2096_s9 }
  0x11   : > { %1999 = vset.pattern.permute.xlu0 %v546_v1  ;;  %v538_v2 = vld [vmem:[%s502_s8] sm:$0xff]  ;;  %v539_v9 = vld [vmem:[%s502_s8 + $0x8] sm:$0xff]  ;;  %s2110_s15 = scalar_lea.vmem %s2740_s2, %s2096_s9  ;;  %s2118_s18 = scalar_lea.vmem %s2744_s6, %s1972_s28 }
  0x12   : > { %v542_v3 = vadd.f32 1.0, %v538_v2  ;;  %v543_v11 = vadd.f32 1.0, %v539_v9  ;;  %v736_v21 = vld [vmem:[%s2102_s12] sm:$0xff]  ;;  %v737_v31 = vld [vmem:[%s2102_s12 + $0x8] sm:$0xff]  ;;  %s1967_s19 = sshll.u32 %s2769_s24, 7  ;;  %s2175_s29 = scalar_lea.vmem %s2741_s3, %s2096_s9 }
  0x13   : > { %v751_v22 = vperm.slane %v736_v21, 1  ;;  %v744_v23 = vperm.slane %v736_v21, 0  ;;  %v772_v25 = vperm.slane %v736_v21, 4  ;;  %v765_v26 = vperm.slane %v736_v21, 3  ;;  %v738_v38 = vld [vmem:[%s2110_s15] sm:$0xff]  ;;  %s2130_s22 = scalar_lea.vmem %s2738_s0, %s1967_s19  ;;  %v739_v57 = vld [vmem:[%s2110_s15 + $0x8] sm:$0xff]  ;;  %s2383_s10 = scalar_lea.vmem %s2742_s4, %s2096_s9 }
  0x14   : > { %v572_v4 = vperm.slane %v542_v3, 4  ;;  %v558_v5 = vperm.slane %v542_v3, 2  ;;  %v544_v6 = vperm.slane %v542_v3, 0  ;;  %v579_v7 = vperm.slane %v542_v3, 5  ;;  %v2121_v42 = vld [vmem:[%s2118_s18] sm:$0xff]  ;;  %v2141_v59 = vld [vmem:[%s2130_s22 + $0x28] sm:$0xff] }
  0x15   : > { %v565_v8 = vperm.slane %v542_v3, 3  ;;  %v551_v10 = vperm.slane %v542_v3, 1  ;;  %v600_v12 = vperm.slane %v543_v11, 0  ;;  %v593_v13 = vperm.slane %v542_v3, 7  ;;  %v2133_v49 = vld [vmem:[%s2130_s22 + $0x20] sm:$0xff]  ;;  %v2147_v1 = vld [vmem:[%s2118_s18 + $0x8] sm:$0xff] }
  0x16   : > { %v586_v14 = vperm.slane %v542_v3, 6  ;;  %v621_v15 = vperm.slane %v543_v11, 3  ;;  %v614_v16 = vperm.slane %v543_v11, 2  ;;  %v607_v17 = vperm.slane %v543_v11, 1 }
  0x17   : > { %v642_v18 = vperm.slane %v543_v11, 6  ;;  %v635_v19 = vperm.slane %v543_v11, 5  ;;  %v628_v20 = vperm.slane %v543_v11, 4  ;;  %v649_v24 = vperm.slane %v543_v11, 7 }
  0x18   : > { %577 = vperm.xlu2 %2001, %v572_v4   ;;  %563 = vperm.xlu1 %2000, %v558_v5   ;;  %v758_v27 = vperm.slane %v736_v21, 2  ;;  %v793_v28 = vperm.slane %v736_v21, 7  ;;  %v786_v29 = vperm.slane %v736_v21, 6  ;;  %v779_v30 = vperm.slane %v736_v21, 5  ;;  %v2151_v4 = vld [vmem:[%s2130_s22 + $0x40] sm:$0xff] }
  0x19   : > { %549 = vperm.xlu0 %1999, %v544_v6   ;;  %v814_v32 = vperm.slane %v737_v31, 2  ;;  %v807_v33 = vperm.slane %v737_v31, 1  ;;  %v800_v34 = vperm.slane %v737_v31, 0  ;;  %v835_v35 = vperm.slane %v737_v31, 5 }
  0x1a   : > { %v828_v36 = vperm.slane %v737_v31, 4  ;;  %v821_v37 = vperm.slane %v737_v31, 3  ;;  %v999_v39 = vperm.slane %v738_v38, 0  ;;  %v849_v40 = vperm.slane %v737_v31, 7 }
  0x1b   : > { %v842_v41 = vperm.slane %v737_v31, 6  ;;  %v661_v43 = vrot.slane %v2121_v42, 4  ;;  %v1020_v44 = vperm.slane %v738_v38, 3  ;;  %v1013_v45 = vperm.slane %v738_v38, 2 }
  0x1c   : > { %v1006_v46 = vperm.slane %v738_v38, 1  ;;  %v662_v51 = vrot.slane %v2121_v42, 5  ;;  %v1041_v52 = vperm.slane %v738_v38, 6  ;;  %v1034_v53 = vperm.slane %v738_v38, 5 }
  0x1d   : > { %v676_v47 = vperm.slane %v661_v43, 0  ;;  %v1027_v55 = vperm.slane %v738_v38, 4  ;;  %v1062_v61 = vperm.slane %v739_v57, 1  ;;  %v1055_v62 = vperm.slane %v739_v57, 0 }
  0x1e   : > { %v677_v56 = vperm.slane %v662_v51, 0  ;;  %v1048_v0 = vperm.slane %v738_v38, 7  ;;  %v680_v2 = vperm.slane %v2147_v1, 0  ;;  %v667_v6 = vrot.slane %v2147_v1, 3 }
  0x1f   : > { %v1076_v9 = vperm.slane %v739_v57, 3  ;;  %v1069_v11 = vperm.slane %v739_v57, 2  ;;  %v1090_v31 = vperm.slane %v739_v57, 5 }
  0x20   : > { %584 = vperm.xlu2 %2001, %v579_v7   ;;  %570 = vperm.xlu1 %2000, %v565_v8   ;;  %v659_v7 = vrot.slane %v2121_v42, 2  ;;  %v1083_v8 = vperm.slane %v739_v57, 4 }
  0x21   : > { %556 = vperm.xlu0 %1999, %v551_v10  }
  0x28   : > { %605 = vperm.xlu2 %2001, %v600_v12   ;;  %598 = vperm.xlu1 %2000, %v593_v13   ;;  %v683_v12 = vperm.slane %v667_v6, 0  ;;  %v674_v13 = vperm.slane %v659_v7, 0  ;;  %v2221_v7 = vld [vmem:[%s2130_s22 + $0x38] sm:$0xff] }
  0x29   : > { %591 = vperm.xlu0 %1999, %v586_v14   ;;  %v672_v14 = vperm.slane %v2121_v42, 0 }
  0x30   : > { %626 = vperm.xlu2 %2001, %v621_v15   ;;  %619 = vperm.xlu1 %2000, %v614_v16   ;;  %v2160_v16 = vld [vmem:[%s2130_s22 + $0x58] sm:$0xff] }
  0x31   : > { %612 = vperm.xlu0 %1999, %v607_v17   ;;  %2754 = vst [vmem:[#allocation2_spill] sm:$0xff] %v2160_v16 }
  0x38   : > { %647 = vperm.xlu2 %2001, %v642_v18   ;;  %640 = vperm.xlu1 %2000, %v635_v19   ;;  %v2163_v18 = vld [vmem:[%s2130_s22 + $0x10] sm:$0xff] }
  0x39   : > { %633 = vperm.xlu0 %1999, %v628_v20  }
  0x40   : > { %756 = vperm.xlu2 %2001, %v751_v22   ;;  %749 = vperm.xlu1 %2000, %v744_v23   ;;  %v2166_v22 = vld [vmem:[%s2130_s22] sm:$0xff]  ;;  %v670_v23 = vrot.slane %v2147_v1, 6 }
  0x41   : > { %654 = vperm.xlu0 %1999, %v649_v24   ;;  %v660_v24 = vrot.slane %v2121_v42, 3 }
  0x48   : > { %777 = vperm.xlu2 %2001, %v772_v25   ;;  %770 = vperm.xlu1 %2000, %v765_v26   ;;  %v1104_v26 = vperm.slane %v739_v57, 7 }
  0x49   : > { %763 = vperm.xlu0 %1999, %v758_v27   ;;  %v1097_v27 = vperm.slane %v739_v57, 6 }
  0x50   : > { %798 = vperm.xlu2 %2001, %v793_v28   ;;  %791 = vperm.xlu1 %2000, %v786_v29   ;;  %v658_v28 = vrot.slane %v2121_v42, 1 }
  0x51   : > { %784 = vperm.xlu0 %1999, %v779_v30  }
  0x58   : > { %819 = vperm.xlu2 %2001, %v814_v32   ;;  %812 = vperm.xlu1 %2000, %v807_v33   ;;  %v686_v33 = vperm.slane %v670_v23, 0 }
  0x59   : > { %805 = vperm.xlu0 %1999, %v800_v34   ;;  %v675_v34 = vperm.slane %v660_v24, 0 }
  0x60   : > { %840 = vperm.xlu2 %2001, %v835_v35   ;;  %833 = vperm.xlu1 %2000, %v828_v36   ;;  %v2187_v35 = vld [vmem:[%s2175_s29] sm:$0xff]  ;;  %v673_v36 = vperm.slane %v658_v28, 0 }
  0x61   : > { %826 = vperm.xlu0 %1999, %v821_v37   ;;  %v2190_v37 = vld [vmem:[%s2102_s12 + $0x10] sm:$0xff] }
  0x62   : > { %v1249_v51 = vperm.slane %v2190_v37, 2  ;;  %v1235_v57 = vperm.slane %v2190_v37, 0  ;;  %v1256_v24 = vperm.slane %v2190_v37, 3 }
  0x68   : > { %1004 = vperm.xlu2 %2001, %v999_v39   ;;  %854 = vperm.xlu1 %2000, %v849_v40   ;;  %v2193_v39 = vld [vmem:[%s2130_s22 + $0x70] sm:$0xff] }
  0x69   : > { %847 = vperm.xlu0 %1999, %v842_v41   ;;  %2755 = vst [vmem:[#allocation3_spill] sm:$0xff] %v2193_v39  ;;  %v2196_v41 = vld [vmem:[%s2130_s22 + $0x18] sm:$0xff] }
  0x70   : > { %1025 = vperm.xlu2 %2001, %v1020_v44   ;;  %1018 = vperm.xlu1 %2000, %v1013_v45  }
  0x71   : > { %1011 = vperm.xlu0 %1999, %v1006_v46   ;;  %v2199_v46 = vld [vmem:[%s2130_s22 + $0x8] sm:$0xff] }
  0x72   : > { %v578_v48 = vpop.permute.xlu2 %577 }
  0x73   : > { %v708_v50 = vadd.f32 %v676_v47, %v578_v48  ;;  %v906_v47 = vrot.slane %v2187_v35, 1  ;;  %v664_v48 = vrot.slane %v2121_v42, 7 }
  0x75   : > { %v2137_v54 = vmul.f32 %v708_v50, %v2133_v49 }
  0x78   : > { %1046 = vperm.xlu2 %2001, %v1041_v52   ;;  %1039 = vperm.xlu1 %2000, %v1034_v53   ;;  %v1242_v52 = vperm.slane %v2190_v37, 1  ;;  %v663_v53 = vrot.slane %v2121_v42, 6 }
  0x79   : > { %1032 = vperm.xlu0 %1999, %v1027_v55  }
  0x7a   : > { %v585_v58 = vpop.permute.xlu2 %584  ;;  %v678_v42 = vperm.slane %v663_v53, 0 }
  0x7b   : > { %v709_v60 = vadd.f32 %v677_v56, %v585_v58  ;;  %v907_v58 = vrot.slane %v2187_v35, 2 }
  0x7d   : > { %v2144_v63 = vmul.f32 %v709_v60, %v2141_v59  ;;  %v920_v60 = vperm.slane %v2187_v35, 0 }
  0x80   : > { %1067 = vperm.xlu2 %2001, %v1062_v61   ;;  %1060 = vperm.xlu1 %2000, %v1055_v62   ;;  %v921_v62 = vperm.slane %v906_v47, 0 }
  0x81   : > { %1053 = vperm.xlu0 %1999, %v1048_v0   ;;  %v679_v0 = vperm.slane %v664_v48, 0  ;;  %v2251_v48 = vld [vmem:[%s2130_s22 + $0x50] sm:$0xff] }
  0x82   : > { %v606_v3 = vpop.permute.xlu2 %605 }
  0x83   : > { %v712_v5 = vadd.f32 %v680_v2, %v606_v3  ;;  %v922_v2 = vperm.slane %v907_v58, 0  ;;  %v952_v3 = vmul.f32 %v920_v60, %v2166_v22  ;;  %v669_v60 = vrot.slane %v2147_v1, 5 }
  0x85   : > { %v2156_v10 = vmul.f32 %v712_v5, %v2151_v4  ;;  %v908_v5 = vrot.slane %v2187_v35, 3  ;;  %v968_v28 = vsel %vm872_vm0, %v952_v3, 0.0 }
  0x88   : > { %1088 = vperm.xlu2 %2001, %v1083_v8   ;;  %1081 = vperm.xlu1 %2000, %v1076_v9   ;;  %v953_v9 = vmul.f32 %v921_v62, %v2199_v46 }
  0x89   : > { %1074 = vperm.xlu0 %1999, %v1069_v11  }
  0x8a   : > { %v627_v15 = vpop.permute.xlu2 %626  ;;  %v564_v17 = vpop.permute.xlu1 %563 }
  0x8b   : > { %v715_v19 = vadd.f32 %v683_v12, %v627_v15  ;;  %v706_v20 = vadd.f32 %v674_v13, %v564_v17  ;;  %v550_v21 = vpop.permute.xlu0 %549  ;;  %v2225_v13 = vld [vmem:[%s2130_s22 + $0x30] sm:$0xff]  ;;  %v666_v15 = vrot.slane %v2147_v1, 2 }
  0x8c   : > { %v704_v25 = vadd.f32 %v672_v14, %v550_v21  ;;  %v665_v21 = vrot.slane %v2147_v1, 1 }
  0x8d   : > { %v2178_v29 = vmul.f32 %v715_v19, %v2160_v16  ;;  %v2181_v30 = vmul.f32 %v706_v20, %v2163_v18  ;;  %v1270_v19 = vperm.slane %v2190_v37, 5  ;;  %v1263_v20 = vperm.slane %v2190_v37, 4 }
  0x8e   : > { %v2184_v32 = vmul.f32 %v704_v25, %v2166_v22  ;;  %v909_v25 = vrot.slane %v2187_v35, 4 }
  0x90   : > { %1109 = vperm.xlu2 %2001, %v1104_v26   ;;  %1102 = vperm.xlu1 %2000, %v1097_v27   ;;  %v954_v26 = vmul.f32 %v922_v2, %v2163_v18  ;;  %v668_v2 = vrot.slane %v2147_v1, 4 }
  0x91   : > { %1095 = vperm.xlu0 %1999, %v1090_v31   ;;  %v923_v31 = vperm.slane %v908_v5, 0  ;;  %v1277_v5 = vperm.slane %v2190_v37, 6 }
  0x92   : > { %v648_v38 = vpop.permute.xlu2 %647  ;;  %v571_v40 = vpop.permute.xlu1 %570 }
  0x93   : > { %v718_v43 = vadd.f32 %v686_v33, %v648_v38  ;;  %v707_v44 = vadd.f32 %v675_v34, %v571_v40  ;;  %v557_v45 = vpop.permute.xlu0 %556  ;;  %v969_v33 = vsel %vm872_vm0, %v953_v9, 0.0  ;;  %v682_v34 = vperm.slane %v666_v15, 0  ;;  %v2246_v38 = vld [vmem:[%s2102_s12 + $0x18] sm:$0xff]  ;;  %s2654_s12 = scalar_lea.vmem %s2745_s7, %s1967_s19 }
  0x94   : > { %v705_v50 = vadd.f32 %v673_v36, %v557_v45  ;;  %v681_v36 = vperm.slane %v665_v21, 0  ;;  %v924_v40 = vperm.slane %v909_v25, 0  ;;  %v970_v45 = vadd.f32 %v969_v33, %v968_v28  ;;  %v2277_v25 = vld [vmem:[%s2130_s22 + $0x68] sm:$0xff] }
  0x95   : > { %v2207_v55 = vmul.f32 %v718_v43, %v2193_v39  ;;  %v2210_v56 = vmul.f32 %v707_v44, %v2196_v41  ;;  %v910_v43 = vrot.slane %v2187_v35, 5  ;;  %v971_v44 = vsel %vm872_vm0, %v954_v26, 0.0  ;;  %2756 = vst [vmem:[#allocation4_spill] sm:$0xff] %v2277_v25 }
  0x96   : > { %v2216_v61 = vmul.f32 %v705_v50, %v2199_v46  ;;  %v911_v15 = vrot.slane %v2187_v35, 6  ;;  %v912_v21 = vrot.slane %v2187_v35, 7  ;;  %v1305_v35 = vperm.slane %v2246_v38, 2 }
  0x98   : > { %1254 = vperm.xlu2 %2001, %v1249_v51   ;;  %1247 = vperm.xlu1 %2000, %v1242_v52   ;;  %v955_v51 = vmul.f32 %v923_v31, %v2196_v41  ;;  %v926_v31 = vperm.slane %v911_v15, 0 }
  0x99   : > { %1240 = vperm.xlu0 %1999, %v1235_v57   ;;  %v2255_v57 = vld [vmem:[%s2130_s22 + $0x48] sm:$0xff] }
  0x9a   : > { %v599_v6 = vpop.permute.xlu1 %598  ;;  %v757_v8 = vpop.permute.xlu2 %756 }
  0x9b   : > { %v711_v11 = vadd.f32 %v679_v0, %v599_v6  ;;  %v592_v12 = vpop.permute.xlu0 %591  ;;  %v2228_v14 = vmul.f32 %v757_v8, %v2199_v46  ;;  %v1291_v0 = vperm.slane %v2246_v38, 0  ;;  %v956_v6 = vmul.f32 %v924_v40, %v2133_v49 }
  0x9c   : > { %v710_v17 = vadd.f32 %v678_v42, %v592_v12  ;;  %v1284_v42 = vperm.slane %v2190_v37, 7  ;;  %v972_v8 = vadd.f32 %v971_v44, %v970_v45  ;;  %v973_v12 = vsel %vm872_vm0, %v955_v51, 0.0 }
  0x9d   : > { %v2235_v23 = vmul.f32 %v711_v11, %v2221_v7  ;;  %v925_v11 = vperm.slane %v910_v43, 0  ;;  %v975_v37 = vsel %vm872_vm0, %v956_v6, 0.0  ;;  %v1312_v44 = vperm.slane %v2246_v38, 3 }
  0x9e   : > { %v2241_v27 = vmul.f32 %v710_v17, %v2225_v13  ;;  %v685_v17 = vperm.slane %v669_v60, 0  ;;  %v671_v45 = vrot.slane %v2147_v1, 7  ;;  %v927_v51 = vperm.slane %v912_v21, 0 }
  0x9f   : > { %v957_v28 = vmul.f32 %v925_v11, %v2141_v59  ;;  %v1333_v21 = vperm.slane %v2246_v38, 6 }
  0xa0   : > { %1275 = vperm.xlu2 %2001, %v1270_v19   ;;  %1268 = vperm.xlu1 %2000, %v1263_v20   ;;  %v684_v19 = vperm.slane %v668_v2, 0  ;;  %v974_v20 = vadd.f32 %v973_v12, %v972_v8  ;;  %v687_v1 = vperm.slane %v671_v45, 0  ;;  %v959_v2 = vmul.f32 %v927_v51, %v2221_v7 }
  0xa1   : > { %1261 = vperm.xlu0 %1999, %v1256_v24   ;;  %v977_v60 = vsel %vm872_vm0, %v957_v28, 0.0 }
  0xa2   : > { %v620_v47 = vpop.permute.xlu1 %619  ;;  %v778_v50 = vpop.permute.xlu2 %777 }
  0xa3   : > { %v714_v52 = vadd.f32 %v682_v34, %v620_v47  ;;  %v613_v53 = vpop.permute.xlu0 %612  ;;  %v2258_v58 = vmul.f32 %v778_v50, %v2133_v49  ;;  %v1298_v50 = vperm.slane %v2246_v38, 1 }
  0xa4   : > { %v713_v62 = vadd.f32 %v681_v36, %v613_v53  ;;  %v2281_v36 = vld [vmem:[%s2130_s22 + $0x60] sm:$0xff] }
  0xa5   : > { %v2265_v3 = vmul.f32 %v714_v52, %v2251_v48  ;;  %2757 = vst [vmem:[#allocation5_spill] sm:$0xff] %v2281_v36  ;;  %v976_v52 = vadd.f32 %v975_v37, %v974_v20 }
  0xa6   : > { %v2270_v9 = vmul.f32 %v713_v62, %v2255_v57  ;;  %v2298_v62 = vld [vmem:[%s2175_s29 + $0x8] sm:$0xff] }
  0xa7   : > { %v913_v12 = vrot.slane %v2298_v62, 1  ;;  %v914_v45 = vrot.slane %v2298_v62, 2 }
  0xa8   : > { %1296 = vperm.xlu2 %2001, %v1291_v0   ;;  %1289 = vperm.xlu1 %2000, %v1284_v42   ;;  %v958_v0 = vmul.f32 %v926_v31, %v2225_v13  ;;  %v928_v42 = vperm.slane %v2298_v62, 0  ;;  %v1319_v31 = vperm.slane %v2246_v38, 4 }
  0xa9   : > { %1282 = vperm.xlu0 %1999, %v1277_v5   ;;  %v978_v5 = vadd.f32 %v977_v60, %v976_v52  ;;  %v915_v52 = vrot.slane %v2298_v62, 3 }
  0xaa   : > { %v641_v24 = vpop.permute.xlu1 %640  ;;  %v799_v26 = vpop.permute.xlu2 %798  ;;  %v979_v11 = vsel %vm872_vm0, %v958_v0, 0.0 }
  0xab   : > { %v717_v33 = vadd.f32 %v685_v17, %v641_v24  ;;  %v634_v34 = vpop.permute.xlu0 %633  ;;  %v2284_v40 = vmul.f32 %v799_v26, %v2221_v7  ;;  %v2306_v17 = vld [vmem:[%s2130_s22 + $0x78] sm:$0xff]  ;;  %v1326_v24 = vperm.slane %v2246_v38, 5  ;;  %v874_v26 = vsel %vm872_vm0, %v2228_v14, 0.0  ;;  %v2325_v14 = vld [vmem:[%s2110_s15 + $0x10] sm:$0xff] }
  0xac   : > { %v716_v43 = vadd.f32 %v684_v19, %v634_v34  ;;  %2758 = vst [vmem:[#allocation6_spill] sm:$0xff] %v2306_v17  ;;  %v980_v34 = vadd.f32 %v979_v11, %v978_v5 }
  0xad   : > { %v2290_v47 = vmul.f32 %v717_v33, %v2277_v25  ;;  %v960_v33 = vmul.f32 %v928_v42, %v2151_v4  ;;  %v930_v42 = vperm.slane %v914_v45, 0 }
  0xae   : > { %v2294_v53 = vmul.f32 %v716_v43, %v2281_v36 }
  0xaf   : > { %v983_v51 = vsel %vm872_vm0, %v960_v33, 0.0 }
  0xb0   : > { %1317 = vperm.xlu2 %2001, %v1312_v44   ;;  %1310 = vperm.xlu1 %2000, %v1305_v35   ;;  %v981_v35 = vsel %vm872_vm0, %v959_v2, 0.0 }
  0xb1   : > { %1303 = vperm.xlu0 %1999, %v1298_v50   ;;  %v929_v50 = vperm.slane %v913_v12, 0  ;;  %v982_v60 = vadd.f32 %v981_v35, %v980_v34  ;;  %v1496_v12 = vperm.slane %v2325_v14, 1 }
  0xb2   : > { %v820_v6 = vpop.permute.xlu2 %819  ;;  %v750_v8 = vpop.permute.xlu1 %749 }
  0xb3   : > { %v655_v15 = vpop.permute.xlu0 %654  ;;  %v2309_v19 = vmul.f32 %v820_v6, %v2251_v48  ;;  %v856_v37 = vmul.f32 %v750_v8, %v2166_v22  ;;  %v961_v5 = vmul.f32 %v929_v50, %v2255_v57  ;;  %v880_v50 = vsel %vm872_vm0, %v2258_v58, 0.0 }
  0xb4   : > { %v719_v20 = vadd.f32 %v687_v1, %v655_v15  ;;  %v1489_v15 = vperm.slane %v2325_v14, 0  ;;  %v1503_v58 = vperm.slane %v2325_v14, 2 }
  0xb5   : > { %v873_v28 = vsel %vm872_vm0, %v856_v37, 0.0  ;;  %v1340_v37 = vperm.slane %v2246_v38, 7 }
  0xb6   : > { %v2320_v43 = vmul.f32 %v719_v20, %v2306_v17  ;;  %v875_v44 = vadd.f32 %v874_v26, %v873_v28  ;;  %v931_v20 = vperm.slane %v915_v52, 0  ;;  %v962_v26 = vmul.f32 %v930_v42, %v2251_v48 }
  0xb7   : > { %v985_v28 = vsel %vm872_vm0, %v961_v5, 0.0 }
  0xb8   : > { %1338 = vperm.xlu2 %2001, %v1333_v21   ;;  %1331 = vperm.xlu1 %2000, %v1326_v24   ;;  %v984_v21 = vadd.f32 %v983_v51, %v982_v60  ;;  %v963_v45 = vmul.f32 %v931_v20, %v2160_v16  ;;  %v917_v51 = vrot.slane %v2298_v62, 5 }
  0xb9   : > { %1324 = vperm.xlu0 %1999, %v1319_v31   ;;  %v916_v31 = vrot.slane %v2298_v62, 4 }
  0xba   : > { %v841_v0 = vpop.permute.xlu2 %840  ;;  %v771_v1 = vpop.permute.xlu1 %770  ;;  %v986_v38 = vadd.f32 %v985_v28, %v984_v21  ;;  %v989_v21 = vsel %vm872_vm0, %v963_v45, 0.0 }
  0xbb   : > { %v764_v6 = vpop.permute.xlu0 %763  ;;  %v2331_v2 = vmul.f32 %v841_v0, %v2277_v25  ;;  %v859_v8 = vmul.f32 %v771_v1, %v2196_v41  ;;  %v987_v0 = vsel %vm872_vm0, %v962_v26, 0.0 }
  0xbc   : > { %v858_v11 = vmul.f32 %v764_v6, %v2163_v18 }
  0xbd   : > { %v878_v34 = vsel %vm872_vm0, %v859_v8, 0.0  ;;  %v1517_v8 = vperm.slane %v2325_v14, 4 }
  0xbe   : > { %v876_v24 = vsel %vm872_vm0, %v858_v11, 0.0  ;;  %v1510_v11 = vperm.slane %v2325_v14, 3 }
  0xbf   : > { %v877_v33 = vadd.f32 %v876_v24, %v875_v44  ;;  %v932_v44 = vperm.slane %v916_v31, 0 }
  0xc0   : > { %1501 = vperm.xlu2 %2001, %v1496_v12   ;;  %1494 = vperm.xlu1 %2000, %v1489_v15   ;;  %v918_v12 = vrot.slane %v2298_v62, 6  ;;  %v988_v15 = vadd.f32 %v987_v0, %v986_v38  ;;  %v886_v38 = vsel %vm872_vm0, %v2284_v40, 0.0  ;;  %v1524_v40 = vperm.slane %v2325_v14, 5 }
  0xc1   : > { %v879_v35 = vadd.f32 %v878_v34, %v877_v33  ;;  %1345 = vperm.xlu0 %1999, %v1340_v37   ;;  %v933_v37 = vperm.slane %v917_v51, 0  ;;  %v964_v24 = vmul.f32 %v932_v44, %v2281_v36 }
  0xc2   : > { %v2347_v52 = vpop.permute.xlu2 %1004  ;;  %v792_v60 = vpop.permute.xlu1 %791  ;;  %v934_v33 = vperm.slane %v918_v12, 0 }
  0xc3   : > { %v785_v1 = vpop.permute.xlu0 %784  ;;  %v881_v42 = vadd.f32 %v880_v50, %v879_v35  ;;  %v862_v5 = vmul.f32 %v792_v60, %v2225_v13  ;;  %v965_v34 = vmul.f32 %v933_v37, %v2277_v25  ;;  %v990_v35 = vadd.f32 %v989_v21, %v988_v15  ;;  %v2377_v21 = vld [vmem:[%s2110_s15 + $0x18] sm:$0xff] }
  0xc4   : > { %v861_v6 = vmul.f32 %v785_v1, %v2141_v59  ;;  %v991_v45 = vsel %vm872_vm0, %v964_v24, 0.0  ;;  %v919_v60 = vrot.slane %v2298_v62, 7  ;;  %v892_v24 = vsel %vm872_vm0, %v2309_v19, 0.0 }
  0xc5   : > { %v884_v28 = vsel %vm872_vm0, %v862_v5, 0.0  ;;  %v1538_v5 = vperm.slane %v2325_v14, 7  ;;  %v993_v62 = vsel %vm872_vm0, %v965_v34, 0.0  ;;  %v1545_v19 = vperm.slane %v2377_v21, 0 }
  0xc6   : > { %v882_v20 = vsel %vm872_vm0, %v861_v6, 0.0  ;;  %v1531_v6 = vperm.slane %v2325_v14, 6  ;;  %v935_v12 = vperm.slane %v919_v60, 0  ;;  %v1552_v60 = vperm.slane %v2377_v21, 1 }
  0xc7   : > { %v883_v26 = vadd.f32 %v882_v20, %v881_v42 }
  0xc8   : > { %1522 = vperm.xlu2 %2001, %v1517_v8   ;;  %1515 = vperm.xlu1 %2000, %v1510_v11   ;;  %v992_v8 = vadd.f32 %v991_v45, %v990_v35  ;;  %v1559_v45 = vperm.slane %v2377_v21, 2 }
  0xc9   : > { %v885_v31 = vadd.f32 %v884_v28, %v883_v26  ;;  %1508 = vperm.xlu0 %1999, %v1503_v58   ;;  %v966_v58 = vmul.f32 %v934_v33, %v2193_v39  ;;  %v967_v33 = vmul.f32 %v935_v12, %v2306_v17 }
  0xca   : > { %v2363_v50 = vpop.permute.xlu2 %1025  ;;  %v813_v51 = vpop.permute.xlu1 %812  ;;  %v994_v14 = vadd.f32 %v993_v62, %v992_v8 }
  0xcb   : > { %v806_v0 = vpop.permute.xlu0 %805  ;;  %v887_v44 = vadd.f32 %v886_v38, %v885_v31  ;;  %v865_v1 = vmul.f32 %v813_v51, %v2255_v57  ;;  %v995_v31 = vsel %vm872_vm0, %v966_v58, 0.0 }
  0xcc   : > { %v864_v42 = vmul.f32 %v806_v0, %v2151_v4  ;;  %v2396_v0 = vld [vmem:[%s2383_s10] sm:$0xff] }
  0xcd   : > { %v890_v37 = vsel %vm872_vm0, %v865_v1, 0.0  ;;  %v996_v1 = vadd.f32 %v995_v31, %v994_v14  ;;  %v1130_v62 = vrot.slane %v2396_v0, 2  ;;  %v1131_v12 = vrot.slane %v2396_v0, 3 }
  0xce   : > { %v888_v11 = vsel %vm872_vm0, %v864_v42, 0.0 }
  0xcf   : > { %v889_v15 = vadd.f32 %v888_v11, %v887_v44  ;;  %v2400_v44 = vld [vmem:[%s2383_s10 + $0x8] sm:$0xff] }
  0xd0   : > { %1543 = vperm.xlu2 %2001, %v1538_v5   ;;  %1536 = vperm.xlu1 %2000, %v1531_v6   ;;  %v997_v5 = vsel %vm872_vm0, %v967_v33, 0.0  ;;  %v1139_v11 = vrot.slane %v2400_v44, 4 }
  0xd1   : > { %v891_v20 = vadd.f32 %v890_v37, %v889_v15  ;;  %1529 = vperm.xlu0 %1999, %v1524_v40   ;;  %v1129_v40 = vrot.slane %v2396_v0, 1  ;;  %v2409_v15 = vadd.f32 %v997_v5, %v996_v1  ;;  %v898_v37 = vsel %vm872_vm0, %v2331_v2, 0.0 }
  0xd2   : > { %v2387_v26 = vpop.permute.xlu2 %1046  ;;  %v834_v28 = vpop.permute.xlu1 %833  ;;  %v1136_v2 = vrot.slane %v2400_v44, 1  ;;  %v1145_v1 = vperm.slane %v1130_v62, 0 }
  0xd3   : > { %v827_v34 = vpop.permute.xlu0 %826  ;;  %v893_v35 = vadd.f32 %v892_v24, %v891_v20  ;;  %v868_v38 = vmul.f32 %v834_v28, %v2281_v36  ;;  %v1580_v24 = vperm.slane %v2377_v21, 5  ;;  %v1134_v28 = vrot.slane %v2396_v0, 6 }
  0xd4   : > { %v867_v51 = vmul.f32 %v827_v34, %v2160_v16  ;;  %v1152_v62 = vperm.slane %v1136_v2, 0  ;;  %v2448_v16 = vld [vmem:[%s2175_s29 + $0x10] sm:$0xff] }
  0xd5   : > { %v896_v8 = vsel %vm872_vm0, %v868_v38, 0.0  ;;  %v1143_v38 = vperm.slane %v2396_v0, 0 }
  0xd6   : > { %v894_v42 = vsel %vm872_vm0, %v867_v51, 0.0 }
  0xd7   : > { %v895_v6 = vadd.f32 %v894_v42, %v893_v35  ;;  %v1144_v35 = vperm.slane %v1129_v40, 0  ;;  %v1146_v42 = vperm.slane %v1131_v12, 0 }
  0xd8   : > { %1564 = vperm.xlu2 %2001, %v1559_v45   ;;  %1557 = vperm.xlu1 %2000, %v1552_v60   ;;  %v1573_v45 = vperm.slane %v2377_v21, 4  ;;  %v1155_v60 = vperm.slane %v1139_v11, 0 }
  0xd9   : > { %v897_v58 = vadd.f32 %v896_v8, %v895_v6  ;;  %1550 = vperm.xlu0 %1999, %v1545_v19   ;;  %v1566_v19 = vperm.slane %v2377_v21, 3  ;;  %v1142_v6 = vrot.slane %v2400_v44, 7  ;;  %v1149_v8 = vperm.slane %v1134_v28, 0 }
  0xda   : > { %v1068_v20 = vpop.permute.xlu2 %1067  ;;  %v855_v14 = vpop.permute.xlu1 %854  ;;  %v1176_v40 = vmul.f32 %v1144_v35, %v2409_v15  ;;  %v1187_v11 = vmul.f32 %v1155_v60, %v2409_v15  ;;  %v1587_v28 = vperm.slane %v2377_v21, 6 }
  0xdb   : > { %v848_v31 = vpop.permute.xlu0 %847  ;;  %v899_v33 = vadd.f32 %v898_v37, %v897_v58  ;;  %v871_v34 = vmul.f32 %v855_v14, %v2306_v17  ;;  %v1175_v37 = vmul.f32 %v1143_v38, %v2409_v15  ;;  %v1181_v60 = vmul.f32 %v1149_v8, %v2409_v15 }
  0xdc   : > { %v870_v51 = vmul.f32 %v848_v31, %v2193_v39  ;;  %v1133_v31 = vrot.slane %v2396_v0, 5  ;;  %v1184_v8 = vmul.f32 %v1152_v62, %v2409_v15 }
  0xdd   : > { %v902_v14 = vsel %vm872_vm0, %v871_v34, 0.0  ;;  %v1594_v34 = vperm.slane %v2377_v21, 7 }
  0xde   : > { %v900_v5 = vsel %vm872_vm0, %v870_v51, 0.0  ;;  %v1177_v51 = vmul.f32 %v1145_v1, %v2409_v15  ;;  %v1148_v21 = vperm.slane %v1133_v31, 0 }
  0xdf   : > { %v901_v58 = vadd.f32 %v900_v5, %v899_v33  ;;  %v1178_v33 = vmul.f32 %v1146_v42, %v2409_v15 }
  0xe0   : > { %1585 = vperm.xlu2 %2001, %v1580_v24   ;;  %1578 = vperm.xlu1 %2000, %v1573_v45   ;;  %v1132_v24 = vrot.slane %v2396_v0, 4  ;;  %v1158_v45 = vperm.slane %v1142_v6, 0 }
  0xe1   : > { %v2428_v12 = vadd.f32 %v902_v14, %v901_v58  ;;  %1571 = vperm.xlu0 %1999, %v1566_v19  }
  0xe2   : > { %v1089_v35 = vpop.permute.xlu2 %1088  ;;  %v1019_v38 = vpop.permute.xlu1 %1018 }
  0xe3   : > { %v1012_v5 = vpop.permute.xlu0 %1011  ;;  %v1123_v2 = vmul.f32 %v1089_v35, %v2428_v12  ;;  %v1113_v19 = vmul.f32 %v1019_v38, %v2428_v12  ;;  %v1111_v1 = vmul.f32 %v2347_v52, %v2428_v12  ;;  %v1114_v42 = vmul.f32 %v2363_v50, %v2428_v12 }
  0xe4   : > { %v1112_v58 = vmul.f32 %v1012_v5, %v2428_v12  ;;  %v1117_v6 = vmul.f32 %v2387_v26, %v2428_v12  ;;  %v1147_v38 = vperm.slane %v1132_v24, 0  ;;  %v1120_v52 = vmul.f32 %v1068_v20, %v2428_v12 }
  0xe5   : > { %v1203_v14 = vadd.f32 %v1187_v11, %v1123_v2  ;;  %v1193_v17 = vadd.f32 %v1177_v51, %v1113_v19  ;;  %v1191_v35 = vadd.f32 %v1175_v37, %v1111_v1  ;;  %v1194_v39 = vadd.f32 %v1178_v33, %v1114_v42 }
  0xe6   : > { %v1192_v25 = vadd.f32 %v1176_v40, %v1112_v58  ;;  %v1197_v36 = vadd.f32 %v1181_v60, %v1117_v6  ;;  %v1200_v37 = vadd.f32 %v1184_v8, %v1120_v52  ;;  %v1397_v51 = vrot.slane %v2448_v16, 2 }
  0xe7   : > { %v2451_v50 = vadd.f32 %v1203_v14, %v2294_v53  ;;  %v2454_v31 = vadd.f32 %v1193_v17, %v2181_v30  ;;  %v2457_v26 = vadd.f32 %v1191_v35, %v2184_v32  ;;  %v2460_v11 = vadd.f32 %v1194_v39, %v2210_v56 }
  0xe8   : > { %v2463_v40 = vadd.f32 %v1192_v25, %v2216_v61  ;;  %1599 = vperm.xlu1 %2000, %v1594_v34   ;;  %v2466_v20 = vadd.f32 %v1197_v36, %v2241_v27  ;;  %v1190_v53 = vmul.f32 %v1158_v45, %v2409_v15  ;;  %v1180_v30 = vmul.f32 %v1148_v21, %v2409_v15 }
  0xe9   : > { %1592 = vperm.xlu0 %1999, %v1587_v28   ;;  %v1396_v17 = vrot.slane %v2448_v16, 1  ;;  %v1179_v32 = vmul.f32 %v1147_v38, %v2409_v15  ;;  %v1135_v56 = vrot.slane %v2396_v0, 7  ;;  %v2474_v61 = vadd.f32 %v1200_v37, %v2270_v9 }
  0xea   : > { %v1110_v62 = vpop.permute.xlu2 %1109  ;;  %v1040_v39 = vpop.permute.xlu1 %1039  ;;  %v1410_v33 = vperm.slane %v2448_v16, 0  ;;  %v1151_v45 = vperm.slane %v2400_v44, 0  ;;  %v1412_v1 = vperm.slane %v1397_v51, 0  ;;  %v1138_v21 = vrot.slane %v2400_v44, 3 }
  0xeb   : > { %v1033_v25 = vpop.permute.xlu0 %1032  ;;  %v1126_v27 = vmul.f32 %v1110_v62, %v2428_v12  ;;  %v1116_v36 = vmul.f32 %v1040_v39, %v2428_v12  ;;  %v1411_v60 = vperm.slane %v1396_v17, 0  ;;  %v1150_v5 = vperm.slane %v1135_v56, 0 }
  0xec   : > { %v1115_v28 = vmul.f32 %v1033_v25, %v2428_v12  ;;  %v1442_v42 = vmul.f32 %v1410_v33, %v2166_v22  ;;  %v1183_v58 = vmul.f32 %v1151_v45, %v2409_v15  ;;  %v1398_v6 = vrot.slane %v2448_v16, 3 }
  0xed   : > { %v1206_v34 = vadd.f32 %v1190_v53, %v1126_v27  ;;  %v1196_v24 = vadd.f32 %v1180_v30, %v1116_v36  ;;  %v1443_v8 = vmul.f32 %v1411_v60, %v2199_v46  ;;  %v1137_v35 = vrot.slane %v2400_v44, 2 }
  0xee   : > { %v1195_v0 = vadd.f32 %v1179_v32, %v1115_v28  ;;  %v1399_v52 = vrot.slane %v2448_v16, 4  ;;  %v1444_v53 = vmul.f32 %v1412_v1, %v2163_v18  ;;  %v1458_v30 = vsel %vm872_vm0, %v1442_v42, 0.0 }
  0xef   : > { %v2483_v9 = vadd.f32 %v1206_v34, %v2320_v43  ;;  %v2486_v2 = vadd.f32 %v1196_v24, %v2144_v63  ;;  %v1182_v43 = vmul.f32 %v1150_v5, %v2409_v15  ;;  %v1154_v32 = vperm.slane %v1138_v21, 0 }
  0xf0   : > { %v2489_v19 = vadd.f32 %v1195_v0, %v2137_v54  ;;  %v1413_v62 = vperm.slane %v1398_v6, 0  ;;  %v1459_v39 = vsel %vm872_vm0, %v1443_v8, 0.0  ;;  %v1153_v25 = vperm.slane %v1137_v35, 0 }
  0xf1   : > { %v1414_v36 = vperm.slane %v1399_v52, 0  ;;  %v1400_v28 = vrot.slane %v2448_v16, 5  ;;  %v1460_v33 = vadd.f32 %v1459_v39, %v1458_v30  ;;  %v1186_v34 = vmul.f32 %v1154_v32, %v2409_v15 }
  0xf2   : > { %v2497_v14 = vpop.permute.xlu2 %1254  ;;  %v1061_v63 = vpop.permute.xlu1 %1060  ;;  %v1141_v24 = vrot.slane %v2400_v44, 6  ;;  %v1461_v45 = vsel %vm872_vm0, %v1444_v53, 0.0  ;;  %v1445_v60 = vmul.f32 %v1413_v62, %v2196_v41  ;;  %v1185_v0 = vmul.f32 %v1153_v25, %v2409_v15 }
  0xf3   : > { %v1054_v54 = vpop.permute.xlu0 %1053  ;;  %v1119_v38 = vmul.f32 %v1061_v63, %v2428_v12  ;;  %v1140_v1 = vrot.slane %v2400_v44, 5  ;;  %v1415_v6 = vperm.slane %v1400_v28, 0  ;;  %v1462_v8 = vadd.f32 %v1461_v45, %v1460_v33  ;;  %v2543_v45 = vld [vmem:[%s2175_s29 + $0x18] sm:$0xff] }
  0xf4   : > { %v1118_v37 = vmul.f32 %v1054_v54, %v2428_v12  ;;  %v1157_v63 = vperm.slane %v1141_v24, 0  ;;  %v1463_v35 = vsel %vm872_vm0, %v1445_v60, 0.0  ;;  %v1401_v54 = vrot.slane %v2448_v16, 6 }
  0xf5   : > { %v1199_v17 = vadd.f32 %v1183_v58, %v1119_v38  ;;  %v1446_v58 = vmul.f32 %v1414_v36, %v2133_v49  ;;  %v1156_v52 = vperm.slane %v1140_v1, 0  ;;  %v1464_v53 = vadd.f32 %v1463_v35, %v1462_v8 }
  0xf6   : > { %v1198_v56 = vadd.f32 %v1182_v43, %v1118_v37  ;;  %v1402_v30 = vrot.slane %v2448_v16, 7  ;;  %v1447_v62 = vmul.f32 %v1415_v6, %v2141_v59  ;;  %v1416_v39 = vperm.slane %v1401_v54, 0 }
  0xf7   : > { %v2507_v27 = vadd.f32 %v1199_v17, %v2156_v10  ;;  %v1189_v17 = vmul.f32 %v1157_v63, %v2409_v15  ;;  %v1465_v32 = vsel %vm872_vm0, %v1446_v58, 0.0  ;;  %v1418_v1 = vperm.slane %v2543_v45, 0 }
  0xf8   : > { %v2510_v51 = vadd.f32 %v1198_v56, %v2235_v23  ;;  %v1188_v56 = vmul.f32 %v1156_v52, %v2409_v15  ;;  %v1417_v33 = vperm.slane %v1402_v30, 0  ;;  %v1467_v24 = vsel %vm872_vm0, %v1447_v62, 0.0 }
  0xf9   : > { %v1448_v60 = vmul.f32 %v1416_v39, %v2225_v13  ;;  %v1403_v58 = vrot.slane %v2543_v45, 1  ;;  %v1404_v54 = vrot.slane %v2543_v45, 2  ;;  %v1349_v30 = vmul.f32 %v2497_v14, %v2163_v18 }
  0xfa   : > { %v2518_v5 = vpop.permute.xlu2 %1275  ;;  %v1082_v10 = vpop.permute.xlu1 %1081 }
  0xfb   : > { %v1075_v23 = vpop.permute.xlu0 %1074  ;;  %v1122_v42 = vmul.f32 %v1082_v10, %v2428_v12 }
  0xfc   : > { %v1121_v21 = vmul.f32 %v1075_v23, %v2428_v12 }
  0xfd   : > { %v1202_v43 = vadd.f32 %v1186_v34, %v1122_v42  ;;  %v1466_v34 = vadd.f32 %v1465_v32, %v1464_v53  ;;  %v1469_v42 = vsel %vm872_vm0, %v1448_v60, 0.0 }
  0xfe   : > { %v1201_v38 = vadd.f32 %v1185_v0, %v1121_v21 }
  0xff   : > { %v2527_v37 = vadd.f32 %v1202_v43, %v2178_v29  ;;  %v1468_v23 = vadd.f32 %v1467_v24, %v1466_v34  ;;  %v1406_v24 = vrot.slane %v2543_v45, 4 }
 0x100   : > { %v2530_v44 = vadd.f32 %v1201_v38, %v2265_v3  ;;  %v1419_v38 = vperm.slane %v1403_v58, 0 }
 0x101   : > { %v1470_v35 = vadd.f32 %v1469_v42, %v1468_v23 }
 0x102   : > { %v2537_v25 = vpop.permute.xlu2 %1296  ;;  %v1103_v29 = vpop.permute.xlu1 %1102  ;;  %v1451_v62 = vmul.f32 %v1419_v38, %v2255_v57 }
 0x103   : > { %v1096_v36 = vpop.permute.xlu0 %1095  ;;  %v1125_v3 = vmul.f32 %v1103_v29, %v2428_v12 }
 0x104   : > { %v1124_v28 = vmul.f32 %v1096_v36, %v2428_v12  ;;  %v1449_v12 = vmul.f32 %v1417_v33, %v2221_v7  ;;  %v1366_v36 = vsel %vm872_vm0, %v1349_v30, 0.0  ;;  %v2760_v30 = vld [vmem:[#allocation5_spill] sm:$0xff] }
 0x105   : > { %v1205_v16 = vadd.f32 %v1189_v17, %v1125_v3  ;;  %v1405_v17 = vrot.slane %v2543_v45, 3 }
 0x106   : > { %v1204_v0 = vadd.f32 %v1188_v56, %v1124_v28  ;;  %v1471_v63 = vsel %vm872_vm0, %v1449_v12, 0.0 }
 0x107   : > { %v2547_v15 = vadd.f32 %v1205_v16, %v2207_v55  ;;  %v1421_v18 = vperm.slane %v1405_v17, 0  ;;  %v1475_v16 = vsel %vm872_vm0, %v1451_v62, 0.0 }
 0x108   : > { %v2550_v10 = vadd.f32 %v1204_v0, %v2290_v47  ;;  %v1450_v47 = vmul.f32 %v1418_v1, %v2151_v4  ;;  %v1420_v4 = vperm.slane %v1404_v54, 0  ;;  %v1352_v1 = vmul.f32 %v2518_v5, %v2141_v59 }
 0x10a   : > { %v2556_v21 = vpop.permute.xlu2 %1317  ;;  %v1248_v6 = vpop.permute.xlu1 %1247  ;;  %v1452_v34 = vmul.f32 %v1420_v4, %v2251_v48 }
 0x10b   : > { %v1241_v8 = vpop.permute.xlu0 %1240  ;;  %v1348_v43 = vmul.f32 %v1248_v6, %v2199_v46  ;;  %v1472_v46 = vadd.f32 %v1471_v63, %v1470_v35  ;;  %v1407_v6 = vrot.slane %v2543_v45, 5  ;;  %v1372_v63 = vsel %vm872_vm0, %v1352_v1, 0.0 }
 0x10c   : > { %v1347_v55 = vmul.f32 %v1241_v8, %v2166_v22  ;;  %v1473_v22 = vsel %vm872_vm0, %v1450_v47, 0.0  ;;  %v1477_v58 = vsel %vm872_vm0, %v1452_v34, 0.0  ;;  %v1422_v8 = vperm.slane %v1406_v24, 0 }
 0x10d   : > { %v1364_v53 = vsel %vm872_vm0, %v1348_v43, 0.0  ;;  %v1474_v14 = vadd.f32 %v1473_v22, %v1472_v46  ;;  %v2002_v22 = vld [vmem:[%s2130_s22 + $0x40] sm:$0xff] }
 0x10e   : > { %v1363_v52 = vsel %vm872_vm0, %v1347_v55, 0.0  ;;  %v1454_v17 = vmul.f32 %v1422_v8, %v2760_v30  ;;  %v1355_v4 = vmul.f32 %v2002_v22, %v2537_v25  ;;  %v2763_v8 = vld [vmem:[#allocation6_spill] sm:$0xff]  ;;  %v2004_v22 = vld [vmem:[%s2130_s22 + $0x70] sm:$0xff] }
 0x10f   : > { %v1365_v32 = vadd.f32 %v1364_v53, %v1363_v52  ;;  %v1408_v52 = vrot.slane %v2543_v45, 6  ;;  %v1423_v53 = vperm.slane %v1407_v6, 0 }
 0x110   : > { %v1378_v34 = vsel %vm872_vm0, %v1355_v4, 0.0 }
 0x111   : > { %v1367_v33 = vadd.f32 %v1366_v36, %v1365_v32 }
 0x112   : > { %v2570_v39 = vpop.permute.xlu2 %1338  ;;  %v1269_v56 = vpop.permute.xlu1 %1268 }
 0x113   : > { %v1262_v29 = vpop.permute.xlu0 %1261  ;;  %v1351_v28 = vmul.f32 %v1269_v56, %v2133_v49  ;;  %v1476_v49 = vadd.f32 %v1475_v16, %v1474_v14  ;;  %v1361_v4 = vmul.f32 %v2004_v22, %v2570_v39 }
 0x114   : > { %v1350_v3 = vmul.f32 %v1262_v29, %v2196_v41  ;;  %v2759_v41 = vld [vmem:[#allocation2_spill] sm:$0xff]  ;;  %v2761_v29 = vld [vmem:[#allocation4_spill] sm:$0xff] }
 0x115   : > { %v1370_v12 = vsel %vm872_vm0, %v1351_v28, 0.0  ;;  %v1453_v23 = vmul.f32 %v1421_v18, %v2759_v41  ;;  %v1478_v54 = vadd.f32 %v1477_v58, %v1476_v49  ;;  %v1455_v36 = vmul.f32 %v1423_v53, %v2761_v29  ;;  %v2003_v49 = vld [vmem:[%s2130_s22 + $0x58] sm:$0xff] }
 0x116   : > { %v1368_v60 = vsel %vm872_vm0, %v1350_v3, 0.0  ;;  %v1481_v3 = vsel %vm872_vm0, %v1454_v17, 0.0  ;;  %v1409_v28 = vrot.slane %v2543_v45, 7 }
 0x117   : > { %v1369_v0 = vadd.f32 %v1368_v60, %v1367_v33  ;;  %v1479_v35 = vsel %vm872_vm0, %v1453_v23, 0.0 }
 0x118   : > { %v1425_v41 = vperm.slane %v1409_v28, 0 }
 0x119   : > { %v1371_v42 = vadd.f32 %v1370_v12, %v1369_v0  ;;  %v2762_v0 = vld [vmem:[#allocation3_spill] sm:$0xff]  ;;  %v1483_v12 = vsel %vm872_vm0, %v1455_v36, 0.0 }
 0x11a   : > { %v2585_v43 = vpop.permute.xlu2 %1501  ;;  %v1290_v55 = vpop.permute.xlu1 %1289 }
 0x11b   : > { %v1283_v47 = vpop.permute.xlu0 %1282  ;;  %v1354_v5 = vmul.f32 %v1290_v55, %v2221_v7  ;;  %v1373_v38 = vadd.f32 %v1372_v63, %v1371_v42  ;;  %v1424_v7 = vperm.slane %v1408_v52, 0  ;;  %v1358_v42 = vmul.f32 %v2003_v49, %v2556_v21 }
 0x11c   : > { %v1353_v59 = vmul.f32 %v1283_v47, %v2225_v13  ;;  %v1480_v13 = vadd.f32 %v1479_v35, %v1478_v54  ;;  %v1457_v55 = vmul.f32 %v1425_v41, %v2763_v8 }
 0x11d   : > { %v1376_v62 = vsel %vm872_vm0, %v1354_v5, 0.0  ;;  %v1456_v1 = vmul.f32 %v1424_v7, %v2762_v0  ;;  %v1384_v35 = vsel %vm872_vm0, %v1358_v42, 0.0 }
 0x11e   : > { %v1374_v46 = vsel %vm872_vm0, %v1353_v59, 0.0  ;;  %v1482_v24 = vadd.f32 %v1481_v3, %v1480_v13  ;;  %v2614_v59 = vld [vmem:[%s2383_s10 + $0x18] sm:$0xff] }
 0x11f   : > { %v1375_v32 = vadd.f32 %v1374_v46, %v1373_v38  ;;  %v1963_v38 = vld [vmem:[%s2383_s10 + $0x10] sm:$0xff]  ;;  %v1627_v17 = vrot.slane %v2614_v59, 2  ;;  %v1487_v46 = vsel %vm872_vm0, %v1457_v55, 0.0 }
 0x120   : > { %v1619_v13 = vrot.slane %v1963_v38, 1  ;;  %v1620_v36 = vrot.slane %v1963_v38, 2  ;;  %v1633_v39 = vperm.slane %v1963_v38, 0 }
 0x121   : > { %v1377_v56 = vadd.f32 %v1376_v62, %v1375_v32 }
 0x122   : > { %v2600_v18 = vpop.permute.xlu2 %1522  ;;  %v1311_v14 = vpop.permute.xlu1 %1310  ;;  %v1635_v41 = vperm.slane %v1620_v36, 0 }
 0x123   : > { %v1304_v33 = vpop.permute.xlu0 %1303  ;;  %v1357_v16 = vmul.f32 %v1311_v14, %v2251_v48  ;;  %v1379_v60 = vadd.f32 %v1378_v34, %v1377_v56  ;;  %v1485_v48 = vsel %vm872_vm0, %v1456_v1, 0.0  ;;  %v1622_v56 = vrot.slane %v1963_v38, 4 }
 0x124   : > { %v1356_v25 = vmul.f32 %v1304_v33, %v2255_v57  ;;  %v1484_v57 = vadd.f32 %v1483_v12, %v1482_v24  ;;  %v1643_v14 = vperm.slane %v1627_v17, 0 }
 0x125   : > { %v1382_v58 = vsel %vm872_vm0, %v1357_v16, 0.0  ;;  %v1390_v16 = vsel %vm872_vm0, %v1361_v4, 0.0  ;;  %v1637_v0 = vperm.slane %v1622_v56, 0 }
 0x126   : > { %v1380_v45 = vsel %vm872_vm0, %v1356_v25, 0.0  ;;  %v1486_v52 = vadd.f32 %v1485_v48, %v1484_v57  ;;  %v1621_v25 = vrot.slane %v1963_v38, 3  ;;  %v1623_v57 = vrot.slane %v1963_v38, 5 }
 0x127   : > { %v1381_v23 = vadd.f32 %v1380_v45, %v1379_v60  ;;  %v1634_v60 = vperm.slane %v1619_v13, 0 }
 0x128   : > { %v2627_v3 = vadd.f32 %v1487_v46, %v1486_v52  ;;  %v1638_v4 = vperm.slane %v1623_v57, 0 }
 0x129   : > { %v1383_v6 = vadd.f32 %v1382_v58, %v1381_v23  ;;  %v1636_v58 = vperm.slane %v1621_v25, 0 }
 0x12a   : > { %v1544_v47 = vpop.permute.xlu2 %1543  ;;  %v1332_v63 = vpop.permute.xlu1 %1331  ;;  %v1675_v49 = vmul.f32 %v1643_v14, %v2627_v3  ;;  %v1665_v55 = vmul.f32 %v1633_v39, %v2627_v3 }
 0x12b   : > { %v1325_v5 = vpop.permute.xlu0 %1324  ;;  %v1360_v21 = vmul.f32 %v1332_v63, %v2761_v29  ;;  %v1385_v53 = vadd.f32 %v1384_v35, %v1383_v6  ;;  %v1630_v29 = vrot.slane %v2614_v59, 5  ;;  %v1624_v6 = vrot.slane %v1963_v38, 6 }
 0x12c   : > { %v1359_v54 = vmul.f32 %v1325_v5, %v2760_v30  ;;  %v1625_v30 = vrot.slane %v1963_v38, 7  ;;  %v1666_v63 = vmul.f32 %v1634_v60, %v2627_v3  ;;  %v1669_v5 = vmul.f32 %v1637_v0, %v2627_v3 }
 0x12d   : > { %v1388_v7 = vsel %vm872_vm0, %v1360_v21, 0.0  ;;  %v1646_v45 = vperm.slane %v1630_v29, 0  ;;  %v1667_v35 = vmul.f32 %v1635_v41, %v2627_v3  ;;  %v1668_v22 = vmul.f32 %v1636_v58, %v2627_v3 }
 0x12e   : > { %v1386_v32 = vsel %vm872_vm0, %v1359_v54, 0.0  ;;  %v1640_v12 = vperm.slane %v1625_v30, 0  ;;  %v1670_v60 = vmul.f32 %v1638_v4, %v2627_v3  ;;  %v1629_v58 = vrot.slane %v2614_v59, 4 }
 0x12f   : > { %v1387_v62 = vadd.f32 %v1386_v32, %v1385_v53  ;;  %v1678_v54 = vmul.f32 %v1646_v45, %v2627_v3  ;;  %v1641_v45 = vperm.slane %v2614_v59, 0 }
 0x131   : > { %v1389_v28 = vadd.f32 %v1388_v7, %v1387_v62  ;;  %v1639_v62 = vperm.slane %v1624_v6, 0  ;;  %v1673_v57 = vmul.f32 %v1641_v45, %v2627_v3 }
 0x132   : > { %v1565_v33 = vpop.permute.xlu2 %1564  ;;  %v1495_v34 = vpop.permute.xlu1 %1494 }
 0x133   : > { %v1346_v24 = vpop.permute.xlu0 %1345  ;;  %v1391_v23 = vadd.f32 %v1390_v16, %v1389_v28 }
 0x134   : > { %v1362_v1 = vmul.f32 %v1346_v24, %v2763_v8  ;;  %v1672_v8 = vmul.f32 %v1640_v12, %v2627_v3 }
 0x136   : > { %v1392_v42 = vsel %vm872_vm0, %v1362_v1, 0.0 }
 0x137   : > { %v2633_v48 = vadd.f32 %v1392_v42, %v1391_v23 }
 0x139   : > { %v1611_v21 = vmul.f32 %v1565_v33, %v2633_v48  ;;  %v1601_v52 = vmul.f32 %v1495_v34, %v2633_v48  ;;  %v1602_v38 = vmul.f32 %v2585_v43, %v2633_v48  ;;  %v1605_v53 = vmul.f32 %v2600_v18, %v2633_v48 }
 0x13a   : > { %v1608_v17 = vmul.f32 %v1544_v47, %v2633_v48  ;;  %v1586_v46 = vpop.permute.xlu2 %1585  ;;  %v1516_v32 = vpop.permute.xlu1 %1515 }
 0x13b   : > { %v1691_v13 = vadd.f32 %v1675_v49, %v1611_v21  ;;  %v1681_v56 = vadd.f32 %v1665_v55, %v1601_v52  ;;  %v1682_v7 = vadd.f32 %v1666_v63, %v1602_v38  ;;  %v1685_v30 = vadd.f32 %v1669_v5, %v1605_v53  ;;  %v1509_v36 = vpop.permute.xlu0 %1508 }
 0x13c   : > { %v1688_v43 = vadd.f32 %v1672_v8, %v1608_v17  ;;  %v1603_v18 = vmul.f32 %v1509_v36, %v2633_v48  ;;  %v1614_v47 = vmul.f32 %v1586_v46, %v2633_v48  ;;  %v1604_v29 = vmul.f32 %v1516_v32, %v2633_v48 }
 0x13d   : > { %v1707_v28 = vadd.f32 %v1691_v13, %v2530_v44  ;;  %v1697_v14 = vadd.f32 %v1681_v56, %v2457_v26  ;;  %v1698_v33 = vadd.f32 %v1682_v7, %v2463_v40  ;;  %v1701_v34 = vadd.f32 %v1685_v30, %v2489_v19 }
 0x13e   : > { %v1704_v25 = vadd.f32 %v1688_v43, %v2510_v51  ;;  %v1683_v16 = vadd.f32 %v1667_v35, %v1603_v18  ;;  %v1694_v24 = vadd.f32 %v1678_v54, %v1614_v47  ;;  %v1684_v39 = vadd.f32 %v1668_v22, %v1604_v29 }
 0x13f   : > { %1723 = vst.msk [vmem:[%s2654_s12 + $0x50] sm:$0xff] %vm872_vm0, %v1707_v28  ;;  %v1671_v19 = vmul.f32 %v1639_v62, %v2627_v3  ;;  %v1626_v51 = vrot.slane %v2614_v59, 1  ;;  %v1628_v55 = vrot.slane %v2614_v59, 3  ;;  %v1645_v8 = vperm.slane %v1629_v58, 0 }
 0x140   : > { %1713 = vst.msk [vmem:[%s2654_s12] sm:$0xff] %vm872_vm0, %v1697_v14  ;;  %v1699_v44 = vadd.f32 %v1683_v16, %v2454_v31  ;;  %v1710_v26 = vadd.f32 %v1694_v24, %v2550_v10  ;;  %v1700_v40 = vadd.f32 %v1684_v39, %v2460_v11  ;;  %v1632_v53 = vrot.slane %v2614_v59, 7 }
 0x141   : > { %1714 = vst.msk [vmem:[%s2654_s12 + $0x8] sm:$0xff] %vm872_vm0, %v1698_v33  ;;  %v1642_v12 = vperm.slane %v1626_v51, 0  ;;  %v1644_v54 = vperm.slane %v1628_v55, 0  ;;  %v1677_v38 = vmul.f32 %v1645_v8, %v2627_v3  ;;  %v1631_v32 = vrot.slane %v2614_v59, 6 }
 0x142   : > { %1717 = vst.msk [vmem:[%s2654_s12 + $0x20] sm:$0xff] %vm872_vm0, %v1701_v34  ;;  %v1537_v0 = vpop.permute.xlu1 %1536  ;;  %v1648_v62 = vperm.slane %v1632_v53, 0 }
 0x143   : > { %1720 = vst.msk [vmem:[%s2654_s12 + $0x38] sm:$0xff] %vm872_vm0, %v1704_v25  ;;  %v1530_v31 = vpop.permute.xlu0 %1529  ;;  %v1607_v10 = vmul.f32 %v1537_v0, %v2633_v48  ;;  %v1674_v42 = vmul.f32 %v1642_v12, %v2627_v3  ;;  %v1676_v17 = vmul.f32 %v1644_v54, %v2627_v3  ;;  %v1647_v56 = vperm.slane %v1631_v32, 0 }
 0x144   : > { %1715 = vst.msk [vmem:[%s2654_s12 + $0x10] sm:$0xff] %vm872_vm0, %v1699_v44  ;;  %v1606_v11 = vmul.f32 %v1530_v31, %v2633_v48  ;;  %v1680_v36 = vmul.f32 %v1648_v62, %v2627_v3 }
 0x145   : > { %1726 = vst.msk [vmem:[%s2654_s12 + $0x68] sm:$0xff] %vm872_vm0, %v1710_v26  ;;  %v1687_v1 = vadd.f32 %v1671_v19, %v1607_v10  ;;  %v1679_v59 = vmul.f32 %v1647_v56, %v2627_v3 }
 0x146   : > { %1716 = vst.msk [vmem:[%s2654_s12 + $0x18] sm:$0xff] %vm872_vm0, %v1700_v40  ;;  %v1686_v41 = vadd.f32 %v1670_v60, %v1606_v11 }
 0x147   : > { %v1703_v23 = vadd.f32 %v1687_v1, %v2466_v20 }
 0x148   : > { %v1702_v49 = vadd.f32 %v1686_v41, %v2486_v2 }
 0x149   : > { %1719 = vst.msk [vmem:[%s2654_s12 + $0x30] sm:$0xff] %vm872_vm0, %v1703_v23 }
 0x14a   : > { %1718 = vst.msk [vmem:[%s2654_s12 + $0x28] sm:$0xff] %vm872_vm0, %v1702_v49  ;;  %v1558_v6 = vpop.permute.xlu1 %1557 }
 0x14b   : > { %v1551_v63 = vpop.permute.xlu0 %1550  ;;  %v1610_v20 = vmul.f32 %v1558_v6, %v2633_v48 }
 0x14c   : > { %v1609_v2 = vmul.f32 %v1551_v63, %v2633_v48 }
 0x14d   : > { %v1690_v5 = vadd.f32 %v1674_v42, %v1610_v20 }
 0x14e   : > { %v1689_v35 = vadd.f32 %v1673_v57, %v1609_v2 }
 0x14f   : > { %v1706_v21 = vadd.f32 %v1690_v5, %v2474_v61 }
 0x150   : > { %v1705_v52 = vadd.f32 %v1689_v35, %v2507_v27 }
 0x151   : > { %1722 = vst.msk [vmem:[%s2654_s12 + $0x48] sm:$0xff] %vm872_vm0, %v1706_v21 }
 0x152   : > { %1721 = vst.msk [vmem:[%s2654_s12 + $0x40] sm:$0xff] %vm872_vm0, %v1705_v52  ;;  %v1579_v46 = vpop.permute.xlu1 %1578 }
 0x153   : > { %v1572_v22 = vpop.permute.xlu0 %1571  ;;  %v1613_v61 = vmul.f32 %v1579_v46, %v2633_v48 }
 0x154   : > { %v1612_v27 = vmul.f32 %v1572_v22, %v2633_v48 }
 0x155   : > { %v1693_v4 = vadd.f32 %v1677_v38, %v1613_v61 }
 0x156   : > { %v1692_v13 = vadd.f32 %v1676_v17, %v1612_v27 }
 0x157   : > { %v1709_v7 = vadd.f32 %v1693_v4, %v2451_v50 }
 0x158   : > { %v1708_v30 = vadd.f32 %v1692_v13, %v2527_v37 }
 0x159   : > { %1725 = vst.msk [vmem:[%s2654_s12 + $0x60] sm:$0xff] %vm872_vm0, %v1709_v7 }
 0x15a   : > { %1724 = vst.msk [vmem:[%s2654_s12 + $0x58] sm:$0xff] %vm872_vm0, %v1708_v30  ;;  %v1600_v43 = vpop.permute.xlu1 %1599 }
 0x15b   : > { %v1593_v18 = vpop.permute.xlu0 %1592  ;;  %v1616_v47 = vmul.f32 %v1600_v43, %v2633_v48 }
 0x15c   : > { %v1615_v29 = vmul.f32 %v1593_v18, %v2633_v48 }
 0x15d   : > { %v1696_v28 = vadd.f32 %v1680_v36, %v1616_v47 }
 0x15e   : > { %v1695_v14 = vadd.f32 %v1679_v59, %v1615_v29 }
 0x15f   : > { %v1712_v50 = vadd.f32 %v1696_v28, %v2483_v9 }
 0x160   : > { %v1711_v37 = vadd.f32 %v1695_v14, %v2547_v15 }
 0x161   : > { %1728 = vst.msk [vmem:[%s2654_s12 + $0x78] sm:$0xff] %vm872_vm0, %v1712_v50 }
 0x162   : > { %1727 = vst.msk [vmem:[%s2654_s12 + $0x70] sm:$0xff] %vm872_vm0, %v1711_v37 }
 0x163 PF: > { %s17_s26 = sadd.s32 1, %s2027_s26   ;;  %s2764_s24 = smov %s2023_s25 }
 0x164   : > { %p14_p5 = scmp.ge.s32.totalorder %s17_s26, 4   ;;  %s2765_s25 = smov %s2767_s27 }
 0x166   :  { %16 = sbr.rel (!%p14_p5) target bundleno = 2 (0x2), region = 100 }

</bundles_post_ra>
